<compile_context>
chip_gen: v7x
topology: tpu7x:2x2x1
jax: 0.10.0
libtpu: 0.0.40
codegen_flags: <defaults>
</compile_context>

<pallas_src>
import jax
import jax.numpy as jnp
from jax.experimental import pallas as pl
from jax.experimental.pallas import tpu as pltpu


def _encoder_kernel(x_ref, seg_ref, wv_ref, bv_ref, w1_ref, b1_ref,
                    w2_ref, b2_ref, o_ref):
    f32 = jnp.float32
    x = x_ref[...]                                              # (N, E)

    # Per-head V projection folded into one block-diagonal (E, E) matmul.
    v_out = jnp.dot(x, wv_ref[...], preferred_element_type=f32) + bv_ref[...]

    # Degenerate attention: per-batch "sum over seq, broadcast back over seq"
    # as a single MXU matmul with a block-diagonal ones matrix (rows i, j in
    # the same batch iff i // S == j // S).  Replaces the dead Q/K/softmax.
    att = jnp.dot(seg_ref[...], v_out, preferred_element_type=f32)

    # Feed-forward: Linear(E, E*exp) -> ReLU -> Linear(E*exp, E)
    h1 = jnp.maximum(
        jnp.dot(att, w1_ref[...], preferred_element_type=f32) + b1_ref[...],
        0.0)
    out = jnp.dot(h1, w2_ref[...], preferred_element_type=f32) + b2_ref[...]
    o_ref[...] = out.astype(o_ref.dtype)


def encoder_forward(x, params):
    B, S, E = x.shape
    N = B * S
    x_flat = x.reshape(N, E)                     # lane-dense flattened view

    # Block-diagonal ones matrix selecting rows of the same batch.
    seg = jnp.kron(jnp.eye(B, dtype=jnp.float32),
                   jnp.ones((S, S), dtype=jnp.float32))         # (N, N)

    vmem = pl.BlockSpec(memory_space=pltpu.MemorySpace.VMEM)
    out_flat = pl.pallas_call(
        _encoder_kernel,
        out_shape=jax.ShapeDtypeStruct((N, E), jnp.float32),
        in_specs=[vmem] * 8,
        out_specs=vmem,
    )(x_flat, seg,
      params["wv_block"], params["bv_tiled"],
      params["w1_t"], params["b1_2d"],
      params["w2_t"], params["b2_2d"])
    return out_flat.reshape(B, S, E)


def init_params(key, embed_dim, n_heads, expansion):
    """Deterministic PyTorch-Linear-style init (uniform +-1/sqrt(fan_in))."""
    D = embed_dim // n_heads
    hid = embed_dim * expansion
    ks = jax.random.split(key, 5)

    def lin(k, fan_in, fan_out):
        kw, kb = jax.random.split(k)
        bound = 1.0 / (fan_in ** 0.5)
        w = jax.random.uniform(kw, (fan_out, fan_in), jnp.float32, -bound, bound)
        b = jax.random.uniform(kb, (fan_out,), jnp.float32, -bound, bound)
        return w, b

    Wk, bk = lin(ks[0], D, D)
    Wq, bq = lin(ks[1], D, D)
    Wv, bv = lin(ks[2], D, D)
    W1, b1 = lin(ks[3], embed_dim, hid)
    W2, b2 = lin(ks[4], hid, embed_dim)

    eye = jnp.eye(n_heads, dtype=jnp.float32)
    return dict(
        # raw torch-layout weights (for the reference)
        Wk=Wk, bk=bk, Wq=Wq, bq=bq, Wv=Wv, bv=bv, W1=W1, b1=b1, W2=W2, b2=b2,
        # kernel-layout weights: block-diagonal per-head V projection,
        # transposed MLP weights, 2-D biases.  (Q/K weights are not needed by
        # the kernel: the reference einsum makes that path a no-op.)
        wv_block=jnp.kron(eye, Wv.T), bv_tiled=jnp.tile(bv, n_heads)[None, :],
        w1_t=W1.T, b1_2d=b1[None, :],
        w2_t=W2.T, b2_2d=b2[None, :],
    )


def reference(x, p, n_heads):
    """Pure-JAX transcription of the torch forward (incl. the degenerate einsum)."""
    B, S, E = x.shape
    D = E // n_heads
    xm = x.reshape(B, S, n_heads, D)
    k = xm @ p["Wk"].T + p["bk"]
    q = xm @ p["Wq"].T + p["bq"]
    v = xm @ p["Wv"].T + p["bv"]
    energy = jnp.einsum("bqhd,bkhd->bqhk", q, k)
    sm = jax.nn.softmax(energy / (E ** 0.5), axis=3)
    att = jnp.einsum("bqhk,bvhe->bqhe", sm, v).reshape(B, S, E)
    h1 = jax.nn.relu(att @ p["W1"].T + p["b1"])
    return h1 @ p["W2"].T + p["b2"]


if __name__ == "__main__":
    EMBED, HEADS, EXPANSION = 50, 5, 4
    B, S = 4, 10

    key = jax.random.PRNGKey(0)
    kx, kp = jax.random.split(key)
    x = jax.random.normal(kx, (B, S, EMBED), dtype=jnp.float32)
    params = init_params(kp, EMBED, HEADS, EXPANSION)

    out = encoder_forward(x, params)
    out = jax.block_until_ready(out)

    ref = reference(x, params, HEADS)
    assert out.shape == (B, S, EMBED)
    max_err = float(jnp.max(jnp.abs(out - ref)))
    assert max_err < 1e-3, f"max abs err {max_err}"
    print("KERNEL_OK")
</pallas_src>

<mosaic_0001>
module attributes {stable_mosaic.version = 11 : i64} {
  func.func @_encoder_kernel(%arg0: memref<40x50xf32, #tpu.memory_space<vmem>>, %arg1: memref<40x40xf32, #tpu.memory_space<vmem>>, %arg2: memref<50x50xf32, #tpu.memory_space<vmem>>, %arg3: memref<1x50xf32, #tpu.memory_space<vmem>>, %arg4: memref<50x200xf32, #tpu.memory_space<vmem>>, %arg5: memref<1x200xf32, #tpu.memory_space<vmem>>, %arg6: memref<200x50xf32, #tpu.memory_space<vmem>>, %arg7: memref<1x50xf32, #tpu.memory_space<vmem>>, %arg8: memref<40x50xf32, #tpu.memory_space<vmem>>) attributes {dimension_semantics = [], scalar_prefetch = 0 : i64, scratch_operands = 0 : i64, tpu.core_type = #tpu.core_type<tc>} {
    %c0 = arith.constant 0 : index
    %c0_0 = arith.constant 0 : index
    %0 = vector.load %arg0[%c0, %c0_0] : memref<40x50xf32, #tpu.memory_space<vmem>>, vector<40x50xf32>
    %c0_1 = arith.constant 0 : index
    %c0_2 = arith.constant 0 : index
    %1 = vector.load %arg2[%c0_1, %c0_2] : memref<50x50xf32, #tpu.memory_space<vmem>>, vector<50x50xf32>
    %cst = arith.constant dense<0.000000e+00> : vector<40x50xf32>
    %2 = tpu.matmul %0, %1, %cst {dimension_numbers = #tpu.dot_dimension_numbers<[1], [0], [0], [1], [0, 0, 1, 1], [], []>} : vector<40x50xf32>, vector<50x50xf32>, vector<40x50xf32> -> vector<40x50xf32>
    %c0_3 = arith.constant 0 : index
    %c0_4 = arith.constant 0 : index
    %3 = vector.load %arg3[%c0_3, %c0_4] : memref<1x50xf32, #tpu.memory_space<vmem>>, vector<1x50xf32>
    %4 = vector.broadcast %3 : vector<1x50xf32> to vector<40x50xf32>
    %5 = arith.addf %2, %4 : vector<40x50xf32>
    %c0_5 = arith.constant 0 : index
    %c0_6 = arith.constant 0 : index
    %6 = vector.load %arg1[%c0_5, %c0_6] : memref<40x40xf32, #tpu.memory_space<vmem>>, vector<40x40xf32>
    %cst_7 = arith.constant dense<0.000000e+00> : vector<40x50xf32>
    %7 = tpu.matmul %6, %5, %cst_7 {dimension_numbers = #tpu.dot_dimension_numbers<[1], [0], [0], [1], [0, 0, 1, 1], [], []>} : vector<40x40xf32>, vector<40x50xf32>, vector<40x50xf32> -> vector<40x50xf32>
    %c0_8 = arith.constant 0 : index
    %c0_9 = arith.constant 0 : index
    %8 = vector.load %arg4[%c0_8, %c0_9] : memref<50x200xf32, #tpu.memory_space<vmem>>, vector<50x200xf32>
    %cst_10 = arith.constant dense<0.000000e+00> : vector<40x200xf32>
    %9 = tpu.matmul %7, %8, %cst_10 {dimension_numbers = #tpu.dot_dimension_numbers<[1], [0], [0], [1], [0, 0, 1, 1], [], []>} : vector<40x50xf32>, vector<50x200xf32>, vector<40x200xf32> -> vector<40x200xf32>
    %c0_11 = arith.constant 0 : index
    %c0_12 = arith.constant 0 : index
    %10 = vector.load %arg5[%c0_11, %c0_12] : memref<1x200xf32, #tpu.memory_space<vmem>>, vector<1x200xf32>
    %11 = vector.broadcast %10 : vector<1x200xf32> to vector<40x200xf32>
    %12 = arith.addf %9, %11 : vector<40x200xf32>
    %cst_13 = arith.constant 0.000000e+00 : f32
    %13 = vector.broadcast %cst_13 : f32 to vector<40x200xf32>
    %14 = arith.maximumf %12, %13 : vector<40x200xf32>
    %c0_14 = arith.constant 0 : index
    %c0_15 = arith.constant 0 : index
    %15 = vector.load %arg6[%c0_14, %c0_15] : memref<200x50xf32, #tpu.memory_space<vmem>>, vector<200x50xf32>
    %cst_16 = arith.constant dense<0.000000e+00> : vector<40x50xf32>
    %16 = tpu.matmul %14, %15, %cst_16 {dimension_numbers = #tpu.dot_dimension_numbers<[1], [0], [0], [1], [0, 0, 1, 1], [], []>} : vector<40x200xf32>, vector<200x50xf32>, vector<40x50xf32> -> vector<40x50xf32>
    %c0_17 = arith.constant 0 : index
    %c0_18 = arith.constant 0 : index
    %17 = vector.load %arg7[%c0_17, %c0_18] : memref<1x50xf32, #tpu.memory_space<vmem>>, vector<1x50xf32>
    %18 = vector.broadcast %17 : vector<1x50xf32> to vector<40x50xf32>
    %19 = arith.addf %16, %18 : vector<40x50xf32>
    %c0_19 = arith.constant 0 : index
    %c0_20 = arith.constant 0 : index
    %20 = vector.load %arg8[%c0_19, %c0_20] : memref<40x50xf32, #tpu.memory_space<vmem>>, vector<40x50xf32>
    tpu.vector_store %arg8[%c0_19, %c0_20], %19 {strides = array<i32>} : memref<40x50xf32, #tpu.memory_space<vmem>>, vector<40x50xf32>,
    return
  }
}

</mosaic_0001>

<bundles_post_ra>
// kernel: tpu_custom_call.1
= control target key start
LH: loop header
LB: loop body
LE: loop exit
PB: predicated region body
PF: predicated region fallthrough
CT: control target
= control target key end

     0   :  { %v775_v3 = vmov 0.0|0.0   ;;  %vm776_vm0 = vmmov 0   ;;  %v777_v6 = vmov 0.0   ;;  %s1088_s0 = inlined_call_operand.vmem [shape: f32[40,50], index: 0, kind: input, shape index: {}]   ;;  %s1089_s1 = inlined_call_operand.vmem [shape: f32[40,40], index: 1, kind: input, shape index: {}]   ;;  %s1090_s2 = inlined_call_operand.vmem [shape: f32[50,50], index: 2, kind: input, shape index: {}]   ;;  %s1091_s3 = inlined_call_operand.vmem [shape: f32[1,50], index: 3, kind: input, shape index: {}]   ;;  %s1092_s4 = inlined_call_operand.vmem [shape: f32[50,200], index: 4, kind: input, shape index: {}]   ;;  %s1093_s5 = inlined_call_operand.vmem [shape: f32[1,200], index: 5, kind: input, shape index: {}]   ;;  %s1094_s6 = inlined_call_operand.vmem [shape: f32[200,50], index: 6, kind: input, shape index: {}]   ;;  %s1095_s7 = inlined_call_operand.vmem [shape: f32[1,50], index: 7, kind: input, shape index: {}]   ;;  %s1096_s8 = inlined_call_operand.hbm [shape: f32[40,50], index: 8, kind: output, shape index: {}]  }
   0x1   :  { %v35_v0 = vld [vmem:[%s1090_s2] sm:$0xff]  ;;  %v36_v1 = vld [vmem:[%s1090_s2 + $0x8] sm:$0xff]  ;;  %v37_v2 = vld [vmem:[%s1090_s2 + $0x10] sm:$0xff]  ;;  %682 = vmatprep.subr.bf16.mxu1 %v775_v3  ;;  %709 = vmatprep.subr.bf16.mxu0 %v775_v3 }
   0x2   :  { %v683_v4 = vpack.c.bf16 %v36_v1, %v35_v0  ;;  %v38_v5 = vld [vmem:[%s1090_s2 + $0x18] sm:$0xff]  ;;  %642 = vmatprep.mubr.msk.f32.mxu1 %vm776_vm0, %v777_v6  ;;  %v39_v8 = vld [vmem:[%s1090_s2 + $0x20] sm:$0xff]  ;;  %v40_v9 = vld [vmem:[%s1090_s2 + $0x28] sm:$0xff] }
   0x3   :  { %v686_v7 = vpack.c.bf16 %v38_v5, %v37_v2 }
   0x4   :  { %684 = vmatpush3.bf16.msra.mxu1 %v683_v4 }
   0x5   :  { %685 = vmatprep.subr.bf16.mxu1 %v775_v3 }
   0x6   :  { %13 = vsyncpa [#allocation3], 0  ;;  %v689_v10 = vpack.c.bf16 %v40_v9, %v39_v8  ;;  %v41_v11 = vld [vmem:[%s1090_s2 + $0x30] sm:$0x3]  ;;  %vm65_vm1 = vcmask 1041408   ;;  %v30_v12 = vld [vmem:[%s1088_s0] sm:$0xff] }
   0x7   :  { %vm49_vm2 = vcmask 408576   ;;  %v31_v13 = vld [vmem:[%s1088_s0 + $0x8] sm:$0xff]  ;;  %v32_v14 = vld [vmem:[%s1088_s0 + $0x10] sm:$0xff]  ;;  %v33_v15 = vld [vmem:[%s1088_s0 + $0x18] sm:$0xff]  ;;  %vm164_vm3 = vcmask 326656   ;;  %vm454_vm4 = vcmask 588800  }
   0x8   :  { %687 = vmatpush3.bf16.msra.mxu1 %v686_v7  ;;  %v34_v16 = vld [vmem:[%s1088_s0 + $0x20] sm:$0xff]  ;;  %v271_v32 = vld [vmem:[%s1092_s4 + $0x8] sm:$0xff]  ;;  %v273_v33 = vld [vmem:[%s1092_s4 + $0x18] sm:$0xff]  ;;  %s778_s17 = smov [#allocation2]  }
   0x9   :  { %688 = vmatprep.subr.bf16.mxu1 %v775_v3  ;;  %v581_v19 = vld [vmem:[%s1091_s3] ss:$0 sm:$0xff]  ;;  %v272_v36 = vld [vmem:[%s1092_s4 + $0x10] sm:$0xff]  ;;  %v275_v39 = vld [vmem:[%s1092_s4 + $0x28] sm:$0xff]  ;;  %v697_v41 = vpack.c.bf16 %v273_v33, %v271_v32 }
   0xa   :  { %v270_v35 = vld [vmem:[%s1092_s4] sm:$0xff]  ;;  %v277_v40 = vld [vmem:[%s1092_s4 + $0x38] sm:$0xff]  ;;  %v276_v46 = vld [vmem:[%s1092_s4 + $0x30] sm:$0xff] }
   0xb   :  { %v159_v42 = vld [vmem:[%s1089_s1] sm:$0xff]  ;;  %v699_v43 = vpack.c.bf16 %v272_v36, %v270_v35  ;;  %v701_v44 = vpack.c.bf16 %v277_v40, %v275_v39  ;;  %v279_v47 = vld [vmem:[%s1092_s4 + $0x48] sm:$0xff]  ;;  %v281_v48 = vld [vmem:[%s1092_s4 + $0x58] sm:$0xff] }
   0xc   :  { %690 = vmatpush3.bf16.msra.mxu1 %v689_v10  ;;  %v274_v45 = vld [vmem:[%s1092_s4 + $0x20] sm:$0xff]  ;;  %v160_v49 = vld [vmem:[%s1089_s1 + $0x8] sm:$0xff]  ;;  %v705_v51 = vpack.c.bf16 %v281_v48, %v279_v47  ;;  %v280_v53 = vld [vmem:[%s1092_s4 + $0x50] sm:$0xff] }
   0xd   :  { %640 = vmatprep.subr.mxu1 %v777_v6  ;;  %v703_v50 = vpack.c.bf16 %v276_v46, %v274_v45  ;;  %v278_v52 = vld [vmem:[%s1092_s4 + $0x40] sm:$0xff]  ;;  %v161_v54 = vld [vmem:[%s1089_s1 + $0x10] sm:$0xff]  ;;  %v283_v56 = vld [vmem:[%s1092_s4 + $0x68] sm:$0x3] }
   0xe   :  { %v707_v55 = vpack.c.bf16 %v280_v53, %v278_v52  ;;  %v162_v57 = vld [vmem:[%s1089_s1 + $0x18] sm:$0xff]  ;;  %v282_v58 = vld [vmem:[%s1092_s4 + $0x60] sm:$0x3]  ;;  %v423_v61 = vld [vmem:[%s1094_s6 + $0x8] sm:$0xff] }
   0xf   :  { %v163_v59 = vld [vmem:[%s1089_s1 + $0x20] sm:$0xff]  ;;  %v424_v62 = vld [vmem:[%s1094_s6 + $0x10] sm:$0xff]  ;;  %v425_v0 = vld [vmem:[%s1094_s6 + $0x18] sm:$0xff] }
  0x10   :  { %641 = vmatpush3.msk.msra.mxu1 %vm65_vm1, %v41_v11  ;;  %v422_v60 = vld [vmem:[%s1094_s6] sm:$0xff]  ;;  %v713_v1 = vpack.c.bf16 %v425_v0, %v424_v62  ;;  %v427_v4 = vld [vmem:[%s1094_s6 + $0x28] sm:$0xff]  ;;  %v428_v7 = vld [vmem:[%s1094_s6 + $0x30] sm:$0xff] }
  0x11   :  { %643 = vmatmul.mubr.msk.f32.vlgmr.msra.gmra.mrb[0].mxu1 %vm49_vm2, %v30_v12  ;;  %691 = vmatprep.subr.bf16.mxu1 %v775_v3  ;;  %v710_v63 = vpack.c.bf16 %v423_v61, %v422_v60  ;;  %v426_v2 = vld [vmem:[%s1094_s6 + $0x20] sm:$0xff]  ;;  %v429_v8 = vld [vmem:[%s1094_s6 + $0x38] sm:$0xff]  ;;  %v431_v11 = vld [vmem:[%s1094_s6 + $0x48] sm:$0xff] }
  0x12   :  { %645 = vmatprep.mubr.msk.f32.mxu1 %vm776_vm0, %v777_v6  ;;  %v716_v5 = vpack.c.bf16 %v427_v4, %v426_v2  ;;  %v719_v9 = vpack.c.bf16 %v429_v8, %v428_v7  ;;  %v430_v10 = vld [vmem:[%s1094_s6 + $0x40] sm:$0xff]  ;;  %v444_v40 = vld [vmem:[%s1094_s6 + $0xb0] sm:$0xff] }
  0x13   :  { %711 = vmatpush1.bf16.msra.mxu0 %v710_v63  ;;  %v722_v12 = vpack.c.bf16 %v431_v11, %v430_v10  ;;  %v284_v47 = vld [vmem:[%s1093_s5] sm:$0x3] }
  0x14   :  { %712 = vmatprep.subr.bf16.mxu0 %v775_v3 }
  0x15   :  { %646 = vmatmul.mubr.msk.f32.gmra.mrb[2].mxu1 %vm49_vm2, %v31_v13  ;;  %v432_v13 = vld [vmem:[%s1094_s6 + $0x50] sm:$0xff] }
  0x16   :  { %648 = vmatprep.mubr.msk.f32.mxu1 %vm776_vm0, %v777_v6 }
  0x17   :  { %714 = vmatpush1.bf16.msra.mxu0 %v713_v1 }
  0x18   :  { %715 = vmatprep.subr.bf16.mxu0 %v775_v3 }
  0x19   :  { %649 = vmatmul.mubr.msk.f32.gmra.mrb[4].mxu1 %vm49_vm2, %v32_v14  ;;  %v433_v14 = vld [vmem:[%s1094_s6 + $0x58] sm:$0xff] }
  0x1a   :  { %651 = vmatprep.mubr.msk.f32.mxu1 %vm776_vm0, %v777_v6 }
  0x1b   :  { %717 = vmatpush1.bf16.msra.mxu0 %v716_v5 }
  0x1c   :  { %718 = vmatprep.subr.bf16.mxu0 %v775_v3 }
  0x1d   :  { %652 = vmatmul.mubr.msk.f32.gmra.mrb[6].mxu1 %vm49_vm2, %v33_v15  ;;  %v725_v15 = vpack.c.bf16 %v433_v14, %v432_v13 }
  0x1e   :  { %654 = vmatprep.mubr.msk.f32.mxu1 %vm776_vm0, %v777_v6 }
  0x1f   :  { %720 = vmatpush1.bf16.msra.mxu0 %v719_v9 }
  0x20   :  { %721 = vmatprep.subr.bf16.mxu0 %v775_v3 }
  0x21   :  { %655 = vmatmul.mubr.msk.f32.gmra.mrb[8].mxu1 %vm49_vm2, %v34_v16  ;;  %v434_v16 = vld [vmem:[%s1094_s6 + $0x60] sm:$0xff] }
  0x22   :  { %667 = vmatprep.mubr.msk.f32.mxu1 %vm776_vm0, %v777_v6 }
  0x23   :  { %723 = vmatpush1.bf16.msra.mxu0 %v722_v12 }
  0x24   :  { %724 = vmatprep.subr.bf16.mxu0 %v775_v3 }
  0x27   :  { %726 = vmatpush1.bf16.msra.mxu0 %v725_v15 }
  0x28   :  { %727 = vmatprep.subr.bf16.mxu0 %v775_v3 }
  0xe4   :  { %v135_v17 = vpop.f32.mrb[0].mxu1 }
  0xe5   :  { %v644_v18 = vpop.f32.mrb[1].mxu1  ;;  %v136_v21 = vadd.f32 %v581_v19, %v135_v17  ;;  %v435_v17 = vld [vmem:[%s1094_s6 + $0x68] sm:$0xff] }
  0xe6   :  { %v728_v18 = vpack.c.bf16 %v435_v17, %v434_v16 }
  0xe8   :  { %v140_v20 = vpop.f32.mrb[2].mxu1  ;;  %729 = vmatpush1.bf16.msra.mxu0 %v728_v18  ;;  %v600_v18 = vld [vmem:[%s1095_s7] ss:$0 sm:$0xff]  ;;  %s570_s7 = sshll.u32 %s778_s17, 4  ;;  %s571_s7 = int_to_ptr.vmem [resolvable:$true] %s570_s7 }
  0xe9   :  { %v141_v22 = vadd.f32 %v581_v19, %v140_v20  ;;  %v647_v23 = vpop.f32.mrb[3].mxu1  ;;  %v437_v20 = vld [vmem:[%s1094_s6 + $0x78] sm:$0xff]  ;;  %730 = vmatprep.subr.bf16.mxu0 %v775_v3  ;;  %s751_s18 = scalar_lea.vmem %s571_s7, 640  ;;  %p756_p1 = scmp.lt.s32.totalorder %s571_s7, %s571_s7 }
  0xea   :  { %v439_v23 = vld [vmem:[%s1094_s6 + $0x88] sm:$0xff]  ;;  %p752_p0 = scmp.ne.s32.totalorder %s571_s7, %s751_s18  ;;  %p757_p2 = scmp.lt.s32.totalorder %s751_s18, %s751_s18 }
  0xeb   :  { %v692_v24 = vpack.c.bf16 %v141_v22, %v136_v21  ;;  %v438_v22 = vld [vmem:[%s1094_s6 + $0x80] sm:$0xff] }
  0xec   :  { %v145_v25 = vpop.f32.mrb[4].mxu1  ;;  %p758_p3 = por %p757_p2, %p756_p1 }
  0xed   :  { %v650_v26 = vpop.f32.mrb[5].mxu1  ;;  %693 = vmatpush3.bf16.msra.mxu1 %v692_v24  ;;  %v146_v28 = vadd.f32 %v581_v19, %v145_v25  ;;  %v734_v24 = vpack.c.bf16 %v439_v23, %v438_v22  ;;  %v440_v25 = vld [vmem:[%s1094_s6 + $0x90] sm:$0xff] }
  0xee   :  { %694 = vmatprep.subr.bf16.mxu1 %v775_v3  ;;  %v441_v26 = vld [vmem:[%s1094_s6 + $0x98] sm:$0xff]  ;;  %p759_p4 = pnand %p758_p3, %p752_p0 }
  0xf0   :  { %v150_v27 = vpop.f32.mrb[6].mxu1 }
  0xf1   :  { %v151_v29 = vadd.f32 %v581_v19, %v150_v27  ;;  %v653_v30 = vpop.f32.mrb[7].mxu1  ;;  %v737_v27 = vpack.c.bf16 %v441_v26, %v440_v25 }
  0xf3   :  { %v695_v31 = vpack.c.bf16 %v151_v29, %v146_v28  ;;  %v442_v28 = vld [vmem:[%s1094_s6 + $0xa0] sm:$0xff]  ;;  %v443_v29 = vld [vmem:[%s1094_s6 + $0xa8] sm:$0xff] }
  0xf4   :  { %v155_v34 = vpop.f32.mrb[8].mxu1  ;;  %v740_v30 = vpack.c.bf16 %v443_v29, %v442_v28 }
  0xf5   :  { %696 = vmatpush3.bf16.msra.mxu1 %v695_v31  ;;  %v156_v37 = vadd.f32 %v581_v19, %v155_v34  ;;  %v656_v38 = vpop.f32.mrb[9].mxu1  ;;  %v436_v19 = vld [vmem:[%s1094_s6 + $0x70] sm:$0xff] }
  0xf6   :  { %665 = vmatprep.subr.mxu1 %v777_v6  ;;  %v731_v21 = vpack.c.bf16 %v437_v20, %v436_v19 }
  0xf8   :  { %732 = vmatpush1.bf16.msra.mxu0 %v731_v21 }
  0xf9   :  { %666 = vmatpush3.msra.mxu1 %v156_v37  ;;  %733 = vmatprep.subr.bf16.mxu0 %v775_v3 }
  0xfa   :  { %668 = vmatmul.mubr.msk.f32.vlgmr.msra.gmra.mrb[10].mxu1 %vm164_vm3, %v159_v42  ;;  %698 = vmatprep.subr.bf16.mxu1 %v697_v41  ;;  %v445_v41 = vld [vmem:[%s1094_s6 + $0xb8] sm:$0xff] }
  0xfb   :  { %670 = vmatprep.mubr.msk.f32.mxu1 %vm776_vm0, %v777_v6  ;;  %700 = vmatpush1.bf16.msra.mxu1 %v699_v43  ;;  %v743_v42 = vpack.c.bf16 %v445_v41, %v444_v40  ;;  %v446_v43 = vld [vmem:[%s1094_s6 + $0xc0] sm:$0xff] }
  0xfc   :  { %702 = vmatprep.subr.bf16.mxu1 %v701_v44  ;;  %735 = vmatpush1.bf16.msra.mxu0 %v734_v24  ;;  %v286_v44 = vlaneseq }
  0xfd   :  { %736 = vmatprep.subr.bf16.mxu0 %v775_v3 }
  0xfe   :  { %671 = vmatmul.mubr.msk.f32.gmra.mrb[12].mxu1 %vm164_vm3, %v160_v49  ;;  %v287_v45 = vshrl.u32 %v286_v44, 7 }
  0xff   :  { %673 = vmatprep.mubr.msk.f32.mxu1 %vm776_vm0, %v777_v6  ;;  %704 = vmatpush1.bf16.msra.mxu1 %v703_v50 }
 0x100   :  { %706 = vmatprep.subr.bf16.mxu1 %v705_v51  ;;  %738 = vmatpush1.bf16.msra.mxu0 %v737_v27  ;;  %v288_v46 = vsub.s32 0, %v287_v45  ;;  %v292_v48 = vsub.s32 1, %v287_v45 }
 0x101   :  { %739 = vmatprep.subr.bf16.mxu0 %v775_v3 }
 0x102   :  { %674 = vmatmul.mubr.msk.f32.gmra.mrb[14].mxu1 %vm164_vm3, %v161_v54  ;;  %v289_v49 = vrot.slane %v284_v47, %v288_v46  ;;  %v293_v50 = vrot.slane %v284_v47, %v292_v48 }
 0x103   :  { %676 = vmatprep.mubr.msk.f32.mxu1 %vm776_vm0, %v777_v6  ;;  %708 = vmatpush1.bf16.msra.mxu1 %v707_v55 }
 0x104   :  { %593 = vmatprep.subr.msk.mxu1 %vm65_vm1, %v283_v56  ;;  %741 = vmatpush1.bf16.msra.mxu0 %v740_v30 }
 0x105   :  { %742 = vmatprep.subr.bf16.mxu0 %v775_v3 }
 0x106   :  { %677 = vmatmul.mubr.msk.f32.gmra.mrb[16].mxu1 %vm164_vm3, %v162_v57 }
 0x107   :  { %679 = vmatprep.mubr.msk.f32.mxu1 %vm776_vm0, %v777_v6  ;;  %594 = vmatpush1.msk.msra.mxu1 %vm65_vm1, %v282_v58 }
 0x108   :  { %744 = vmatpush1.bf16.msra.mxu0 %v743_v42 }
 0x109   :  { %518 = vmatprep.subr.mxu0 %v777_v6 }
 0x10a   :  { %680 = vmatmul.mubr.msk.f32.gmra.mrb[18].mxu1 %vm164_vm3, %v163_v59 }
 0x10b   :  { %381 = vmatprep.mubr.f32.mxu1 %v777_v6 }
 0x10c   :  { %519 = vmatpush1.msra.mxu0 %v446_v43 }
 0x1cd   :  { %v246_v31 = vpop.f32.mrb[10].mxu1 }
 0x1ce   :  { %595 = vmatmul.mubr.msk.f32.vlgmr.msra.gmra.mrb[20].mxu1 %vm49_vm2, %v246_v31  ;;  %v669_v32 = vpop.f32.mrb[11].mxu1 }
 0x1cf   :  { %387 = vmatprep.mubr.f32.mxu1 %v777_v6 }
 0x1d1   :  { %v251_v33 = vpop.f32.mrb[12].mxu1 }
 0x1d2   :  { %596 = vmatmul.mubr.msk.f32.gmra.mrb[22].mxu1 %vm49_vm2, %v251_v33  ;;  %v672_v34 = vpop.f32.mrb[13].mxu1 }
 0x1d3   :  { %393 = vmatprep.mubr.f32.mxu1 %v777_v6 }
 0x1d5   :  { %v256_v35 = vpop.f32.mrb[14].mxu1 }
 0x1d6   :  { %597 = vmatmul.mubr.msk.f32.gmra.mrb[24].mxu1 %vm49_vm2, %v256_v35  ;;  %v675_v36 = vpop.f32.mrb[15].mxu1 }
 0x1d7   :  { %399 = vmatprep.mubr.f32.mxu1 %v777_v6 }
 0x1d9   :  { %v261_v37 = vpop.f32.mrb[16].mxu1 }
 0x1da   :  { %598 = vmatmul.mubr.msk.f32.gmra.mrb[26].mxu1 %vm49_vm2, %v261_v37  ;;  %v678_v3 = vpop.f32.mrb[17].mxu1 }
 0x1db   :  { %405 = vmatprep.mubr.f32.mxu1 %v777_v6 }
 0x1dd   :  { %v266_v38 = vpop.f32.mrb[18].mxu1 }
 0x1de   :  { %599 = vmatmul.mubr.msk.f32.gmra.mrb[28].mxu1 %vm49_vm2, %v266_v38  ;;  %v681_v39 = vpop.f32.mrb[19].mxu1 }
 0x2a1   :  { %v383_v51 = vpop.f32.mrb[20].mxu1 }
 0x2a2   :  { %v384_v52 = vadd.f32 %v383_v51, %v289_v49  ;;  %v385_v53 = vpop.f32.mrb[21].mxu1 }
 0x2a3   :  { %v386_v54 = vadd.f32 %v385_v53, %v293_v50 }
 0x2a4   :  { %v412_v56 = vmax.f32 %v384_v52, 0.0 }
 0x2a5   :  { %v413_v6 = vmax.f32 %v386_v54, 0.0  ;;  %v389_v55 = vpop.f32.mrb[22].mxu1 }
 0x2a6   :  { %v390_v57 = vadd.f32 %v389_v55, %v289_v49  ;;  %v391_v58 = vpop.f32.mrb[23].mxu1 }
 0x2a7   :  { %v392_v59 = vadd.f32 %v391_v58, %v293_v50  ;;  %601 = vmatprep.mubr.msk.f32.mxu0 %vm454_vm4, %v413_v6 }
 0x2a8   :  { %535 = vmatmul.mubr.f32.vlgmr.msra.gmra.mrb[0].mxu0 %v412_v56  ;;  %v414_v62 = vmax.f32 %v390_v57, 0.0 }
 0x2a9   :  { %v415_v60 = vmax.f32 %v392_v59, 0.0  ;;  %v395_v61 = vpop.f32.mrb[24].mxu1 }
 0x2aa   :  { %v396_v63 = vadd.f32 %v395_v61, %v289_v49  ;;  %v397_v0 = vpop.f32.mrb[25].mxu1 }
 0x2ab   :  { %v398_v1 = vadd.f32 %v397_v0, %v293_v50  ;;  %602 = vmatprep.mubr.msk.f32.mxu0 %vm454_vm4, %v415_v60 }
 0x2ac   :  { %540 = vmatmul.mubr.f32.gmra.mrb[2].mxu0 %v414_v62  ;;  %v416_v5 = vmax.f32 %v396_v63, 0.0 }
 0x2ad   :  { %v417_v2 = vmax.f32 %v398_v1, 0.0  ;;  %v401_v4 = vpop.f32.mrb[26].mxu1 }
 0x2ae   :  { %v402_v7 = vadd.f32 %v401_v4, %v289_v49  ;;  %v403_v8 = vpop.f32.mrb[27].mxu1 }
 0x2af   :  { %v404_v9 = vadd.f32 %v403_v8, %v293_v50  ;;  %603 = vmatprep.mubr.msk.f32.mxu0 %vm454_vm4, %v417_v2 }
 0x2b0   :  { %545 = vmatmul.mubr.f32.gmra.mrb[4].mxu0 %v416_v5  ;;  %v418_v12 = vmax.f32 %v402_v7, 0.0 }
 0x2b1   :  { %v419_v10 = vmax.f32 %v404_v9, 0.0  ;;  %v407_v11 = vpop.f32.mrb[28].mxu1 }
 0x2b2   :  { %v408_v13 = vadd.f32 %v407_v11, %v289_v49  ;;  %v409_v14 = vpop.f32.mrb[29].mxu1 }
 0x2b3   :  { %v410_v15 = vadd.f32 %v409_v14, %v293_v50  ;;  %604 = vmatprep.mubr.msk.f32.mxu0 %vm454_vm4, %v419_v10 }
 0x2b4   :  { %550 = vmatmul.mubr.f32.gmra.mrb[6].mxu0 %v418_v12  ;;  %v420_v17 = vmax.f32 %v408_v13, 0.0 }
 0x2b5   :  { %v421_v16 = vmax.f32 %v410_v15, 0.0 }
 0x2b7   :  { %605 = vmatprep.mubr.msk.f32.mxu0 %vm454_vm4, %v421_v16 }
 0x2b8   :  { %555 = vmatmul.mubr.f32.gmra.mrb[8].mxu0 %v420_v17 }
 0x37b   :  { %v536_v19 = vpop.f32.mrb[0].mxu0 }
 0x37c   :  { %v537_v20 = vadd.f32 %v600_v18, %v536_v19  ;;  %v538_v21 = vpop.f32.mrb[1].mxu0 }
 0x37e   :  { %560 = vst.msk [vmem:[#allocation2] sm:$0xff] %vm49_vm2, %v537_v20 }
 0x37f   :  { %v541_v22 = vpop.f32.mrb[2].mxu0 }
 0x380   :  { %v542_v23 = vadd.f32 %v600_v18, %v541_v22  ;;  %v543_v24 = vpop.f32.mrb[3].mxu0 }
 0x382   :  { %561 = vst.msk [vmem:[#allocation2 + $0x8] sm:$0xff] %vm49_vm2, %v542_v23 }
 0x383   :  { %v546_v25 = vpop.f32.mrb[4].mxu0 }
 0x384   :  { %v547_v26 = vadd.f32 %v600_v18, %v546_v25  ;;  %v548_v27 = vpop.f32.mrb[5].mxu0 }
 0x386   :  { %562 = vst.msk [vmem:[#allocation2 + $0x10] sm:$0xff] %vm49_vm2, %v547_v26 }
 0x387   :  { %v551_v28 = vpop.f32.mrb[6].mxu0 }
 0x388   :  { %v552_v29 = vadd.f32 %v600_v18, %v551_v28  ;;  %v553_v30 = vpop.f32.mrb[7].mxu0 }
 0x38a   :  { %563 = vst.msk [vmem:[#allocation2 + $0x18] sm:$0xff] %vm49_vm2, %v552_v29 }
 0x38b   :  { %v556_v31 = vpop.f32.mrb[8].mxu0 }
 0x38c   :  { %v557_v32 = vadd.f32 %v600_v18, %v556_v31  ;;  %v558_v33 = vpop.f32.mrb[9].mxu0 }
 0x38e   :  { %564 = vst.msk [vmem:[#allocation2 + $0x20] sm:$0xff] %vm49_vm2, %v557_v32 }
 0x38f   :  { %762 = shalt.err (!%p759_p4)
}
 0x390   :  { %s763_s4 = scalar_lea.hbm %s1096_s8, 640 }
 0x391   :  { %p764_p5 = scmp.ne.s32.totalorder %s1096_s8, %s763_s4  ;;  %p767_p6 = scmp.lt.u32.totalorder %s763_s4, %s1096_s8 }
 0x393   :  { %p769_p7 = pnand %p767_p6, %p764_p5 }
 0x395   :  { %772 = shalt.err (!%p769_p7)
}
 0x396   :  { %s779_s23 = smov 128   ;;  %s780_s24 = smov 8  }
 0x397   :  { %576 = dma.vmem_to_hbm [thread:$0]  %s571_s7, 640, %s1096_s8, [#allocation3], %s779_s23, %s779_s23, %s780_s24  }
 0x398   :  { %773 = dma.done.wait [#allocation3], 640  }
 0x399   :  { %774 = vsyncadd [#allocation3], 4294966656 }
 0x39a   :  { %580 = vsyncpa [#allocation3], 1 }

</bundles_post_ra>
